<compile_context>
chip_gen: v6e
topology: v6e:2x2x1
jax: 0.10.0
libtpu: 0.0.40
codegen_flags: <defaults>
</compile_context>

<pallas_src>
import jax
import jax.numpy as jnp
from jax.experimental import pallas as pl
from jax.experimental.pallas import tpu as pltpu  # noqa: F401  (TPU backend)


def flatten1(x):
    """torch.flatten(x, 1) equivalent.  Metadata-only; the preferred path."""
    return jnp.reshape(x, (x.shape[0], -1))


def _copy_kernel(x_ref, o_ref):
    # Single lane-dense (N, C) VMEM tile; plain vld/vst copy (in-place via
    # input_output_aliases, so no second HBM buffer is materialized).
    o_ref[...] = x_ref[...]


def flatten1_pallas(x):
    """Explicit-kernel variant, kept only so a pallas_call exists to exercise.

    NOTE: pallas_call lowers to an opaque Mosaic custom call and blocks XLA
    fusion; in a real model this flatten should be folded into the consumer
    kernel's BlockSpec (e.g. the FC-head matmul LHS) instead of standing alone.
    """
    n = x.shape[0]
    x2d = jnp.reshape(x, (n, -1))  # zero-cost collapse of trailing 1x1 dims
    c = x2d.shape[1]
    dsize = jnp.dtype(x.dtype).itemsize
    # Policy: whole-array block (no grid) while n*c is tiny; grid over N with
    # >= (512, C) tiles only if the tensor grows to multi-MiB sizes.
    return pl.pallas_call(
        _copy_kernel,
        out_shape=jax.ShapeDtypeStruct((n, c), x.dtype),
        in_specs=[pl.BlockSpec((n, c), lambda: (0, 0))],
        out_specs=pl.BlockSpec((n, c), lambda: (0, 0)),
        input_output_aliases={0: 0},
        cost_estimate=pl.CostEstimate(
            flops=0, transcendentals=0, bytes_accessed=2 * n * c * dsize
        ),
    )(x2d)


if __name__ == "__main__":
    key = jax.random.PRNGKey(0)
    # Same shape as the PyTorch reference: [1, 1280, 1, 1].
    x246 = jax.random.normal(key, (1, 1280, 1, 1), dtype=jnp.float32)

    # Preferred (zero-cost) path.
    x247 = flatten1(x246)
    jax.block_until_ready(x247)

    # Explicit Pallas kernel path (harness / fallback), checked against it.
    x247_k = flatten1_pallas(x246)
    jax.block_until_ready(x247_k)

    ref = jnp.reshape(x246, (x246.shape[0], -1))
    assert x247.shape == (1, 1280), x247.shape
    assert x247.dtype == x246.dtype
    assert jnp.array_equal(x247, ref)
    assert x247_k.shape == (1, 1280), x247_k.shape
    assert x247_k.dtype == x246.dtype
    assert jnp.array_equal(x247_k, ref)

    print("KERNEL_OK")
</pallas_src>

<mosaic_0001>
module attributes {stable_mosaic.version = 11 : i64} {
  func.func @_copy_kernel(%arg0: memref<1x1280xf32, #tpu.memory_space<vmem>>, %arg1: memref<1x1280xf32, #tpu.memory_space<vmem>>) attributes {dimension_semantics = [], scalar_prefetch = 0 : i64, scratch_operands = 0 : i64, tpu.core_type = #tpu.core_type<tc>} {
    %c0 = arith.constant 0 : index
    %c0_0 = arith.constant 0 : index
    %0 = vector.load %arg0[%c0, %c0_0] : memref<1x1280xf32, #tpu.memory_space<vmem>>, vector<1x1280xf32>
    %c0_1 = arith.constant 0 : index
    %c0_2 = arith.constant 0 : index
    %1 = vector.load %arg1[%c0_1, %c0_2] : memref<1x1280xf32, #tpu.memory_space<vmem>>, vector<1x1280xf32>
    tpu.vector_store %arg1[%c0_1, %c0_2], %0 {strides = array<i32>} : memref<1x1280xf32, #tpu.memory_space<vmem>>, vector<1x1280xf32>,
    return
  }
}

</mosaic_0001>

<bundles_post_ra>
// kernel: tpu_custom_call.1
= control target key start
LH: loop header
LB: loop body
LE: loop exit
PB: predicated region body
PF: predicated region fallthrough
CT: control target
= control target key end

     0   :  { %6 = vsyncpa [#allocation3], 0  ;;  %s108_s0 = inlined_call_operand.hbm [shape: f32[1,1280], index: 0, kind: input, shape index: {}, may-alias: {0,1}]   ;;  %s109_s1 = inlined_call_operand.hbm [shape: f32[1,1280], index: 1, kind: output, shape index: {}, may-alias: {0,1}]  }
   0x1   :  { %7 = vsyncpa [#allocation4], 0  ;;  %s90_s6 = smov [#allocation2]  }
   0x2   :  { %s14_s7 = sshll.u32 %s90_s6, 4  ;;  %s15_s7 = int_to_ptr.vmem [resolvable:$true] %s14_s7 }
   0x3   :  { %s54_s8 = scalar_lea.vmem %s15_s7, 160  ;;  %p59_p1 = scmp.lt.s32.totalorder %s15_s7, %s15_s7 }
   0x4   :  { %p55_p0 = scmp.ne.s32.totalorder %s15_s7, %s54_s8  ;;  %p60_p2 = scmp.lt.s32.totalorder %s54_s8, %s54_s8 }
   0x6   :  { %p61_p3 = por %p60_p2, %p59_p1 }
   0x8   :  { %p62_p4 = pnand %p61_p3, %p55_p0 }
   0xa   :  { %65 = shalt.err (!%p62_p4)
}
   0xb   :  { %17 = dma.hbm_to_vmem [thread:$0]  %s108_s0, 160, %s15_s7, [#allocation3]  }
   0xc   :  { %86 = dma.done.wait [#allocation3], 160  }
   0xd   :  { %87 = vsyncadd [#allocation3], 4294967136  ;;  %v24_v0 = vlaneseq  ;;  %s91_s11 = smov [#allocation5]   ;;  %v21_v1 = vld [vmem:[#allocation2] sm:$0xff]  ;;  %v22_v2 = vld [vmem:[#allocation2 + $0x8] sm:$0x3] }
   0xe   :  { %s35_s12 = sshll.u32 %s91_s11, 4  ;;  %23 = vst [vmem:[#allocation5] sm:$0xff] %v21_v1  ;;  %s36_s12 = int_to_ptr.vmem [resolvable:$true] %s35_s12 }
   0xf   :  { %vm26_vm0 = vcmp.lt.s32.totalorder %v24_v0, 256  ;;  %s66_s13 = scalar_lea.vmem %s36_s12, 160  ;;  %p71_p6 = scmp.lt.s32.totalorder %s36_s12, %s36_s12 }
  0x10   :  { %28 = vst.msk [vmem:[#allocation5 + $0x8] sm:$0x3] %vm26_vm0, %v22_v2  ;;  %p67_p5 = scmp.ne.s32.totalorder %s36_s12, %s66_s13  ;;  %p72_p7 = scmp.lt.s32.totalorder %s66_s13, %s66_s13 }
  0x12   :  { %p73_p8 = por %p72_p7, %p71_p6 }
  0x14   :  { %p74_p9 = pnand %p73_p8, %p67_p5 }
  0x16   :  { %77 = shalt.err (!%p74_p9)
}
  0x17   :  { %38 = dma.vmem_to_hbm [thread:$0]  %s36_s12, 160, %s109_s1, [#allocation4]  }
  0x18   :  { %88 = dma.done.wait [#allocation4], 160  }
  0x19   :  { %89 = vsyncadd [#allocation4], 4294967136 }
  0x1a   :  { %42 = vsyncpa [#allocation3], 1 }
  0x1b   :  { %43 = vsyncpa [#allocation4], 1 }

</bundles_post_ra>
